<compile_context>
chip_gen: v5e
topology: v5e:2x2
jax: 0.10.0
libtpu: 0.0.40
codegen_flags: <defaults>
</compile_context>

<pallas_src>
import jax
import jax.numpy as jnp
from jax.experimental import pallas as pl
from jax.experimental.pallas import tpu as pltpu


# --------------------------------------------------------------------------- #
# Kernel
# --------------------------------------------------------------------------- #
def _fr_kernel(x_ref, s0_ref, s1_ref, k1_ref, k2_ref, b_ref, o_ref):
    """Fused relu -> stride-2 gather -> 1x1 conv (x2) -> BN affine -> concat.

    x_ref  : (Cin, 2*TR, W)        contiguous NCHW row block (both row parities)
    s0_ref : (W, Wo)               even-column selection matrix (conv1)
    s1_ref : (W, Wo)               odd-column selection matrix  (conv2)
    k1_ref : (Coh*TR, Cin*2*TR)    kron(scale1*W1, even-row selector)
    k2_ref : (Coh*TR, Cin*2*TR)    kron(scale2*W2, odd-row selector)
    b_ref  : (Cout, 1, 1)          folded BN bias
    o_ref  : (Cout, TR, Wo)        NCHW output block (both branches)
    """
    cin, h2, w = x_ref.shape                  # h2 == 2*TR
    cout, tr, wo = o_ref.shape
    coh = cout // 2

    # ReLU on the whole contiguous row block, then a layout-preserving
    # leading-dim merge (lane dim W untouched).
    a = jnp.maximum(x_ref[...], 0.0).reshape(cin * h2, w)

    # Stride-2 column gather done on the MXU (even cols -> conv1, odd -> conv2).
    ye = jnp.dot(a, s0_ref[...], preferred_element_type=jnp.float32)   # (Cin*2TR, Wo)
    yo = jnp.dot(a, s1_ref[...], preferred_element_type=jnp.float32)

    # Row-parity selection + channel mix (+ folded BN scale) in one matmul
    # per branch via the kron-structured weight.
    z1 = jnp.dot(k1_ref[...], ye, preferred_element_type=jnp.float32)  # (Coh*TR, Wo)
    z2 = jnp.dot(k2_ref[...], yo, preferred_element_type=jnp.float32)

    b = b_ref[...]                                                     # (Cout, 1, 1)
    o_ref[0:coh, :, :] = (z1.reshape(coh, tr, wo) + b[0:coh]).astype(o_ref.dtype)
    o_ref[coh:cout, :, :] = (z2.reshape(coh, tr, wo) + b[coh:cout]).astype(o_ref.dtype)


# --------------------------------------------------------------------------- #
# Tiling heuristics
# --------------------------------------------------------------------------- #
def _vmem_bytes_estimate(tr, cin, cout, w, wo, itemsize=4):
    lane = 128
    x_blk = cin * 2 * tr * max(w, lane) * itemsize        # input block (lane padded)
    o_blk = cout * tr * max(wo, lane) * itemsize          # output block
    kron = 2 * (cout // 2) * tr * (cin * 2 * tr) * itemsize
    sel = 2 * w * max(wo, lane) * itemsize
    bias = cout * 8 * lane * itemsize
    # in/out blocks are double buffered by the Pallas pipeline
    return 2 * (x_blk + o_blk) + kron + sel + bias


def _pick_tile_rows(ho, cin, cout, w, wo, budget=12 * 1024 * 1024):
    """Output rows per grid step: whole image if it fits the budget, else the
    largest multiple-of-8 divisor of Ho that does."""
    if _vmem_bytes_estimate(ho, cin, cout, w, wo) <= budget:
        return ho
    tr = (min(ho, 512) // 8) * 8
    while tr >= 8 and (ho % tr != 0 or _vmem_bytes_estimate(tr, cin, cout, w, wo) > budget):
        tr -= 8
    return tr if (tr >= 8 and ho % tr == 0) else ho


# --------------------------------------------------------------------------- #
# Wrapper
# --------------------------------------------------------------------------- #
def factorized_reduce(x, w1, w2, gamma, beta, running_mean, running_var, eps=1e-5):
    """x: [N, Cin, H, W] (NCHW, float32). Returns [N, Cout, H//2, W//2] in NCHW."""
    N, Cin, H, W = x.shape
    Coh = w1.shape[0]                       # out_channels // 2
    Cout = 2 * Coh
    assert H % 2 == 0 and W % 2 == 0, "even spatial sizes assumed"
    Ho, Wo = H // 2, W // 2

    # ---- fold BN (eval mode) into the conv weights + a single bias ----------
    inv_std = 1.0 / jnp.sqrt(running_var.astype(jnp.float32) + eps)
    scale = gamma.astype(jnp.float32) * inv_std
    bias = beta.astype(jnp.float32) - running_mean.astype(jnp.float32) * scale
    w1m = w1[:, :, 0, 0].astype(jnp.float32) * scale[:Coh, None]   # (Coh, Cin)
    w2m = w2[:, :, 0, 0].astype(jnp.float32) * scale[Coh:, None]   # (Coh, Cin)

    TR = _pick_tile_rows(Ho, Cin, Cout, W, Wo)
    assert Ho % TR == 0
    n_t = Ho // TR

    # ---- tiny constant matrices that put the gather / parity-select / channel
    #      mix on the MXU (built once, outside the kernel) ---------------------
    wi = jnp.arange(W, dtype=jnp.int32)
    woi = jnp.arange(Wo, dtype=jnp.int32)
    s0 = (wi[:, None] == 2 * woi[None, :]).astype(jnp.float32)          # (W, Wo)
    s1 = (wi[:, None] == 2 * woi[None, :] + 1).astype(jnp.float32)      # (W, Wo)
    ri = jnp.arange(TR, dtype=jnp.int32)
    r2 = jnp.arange(2 * TR, dtype=jnp.int32)
    p0 = (r2[None, :] == 2 * ri[:, None]).astype(jnp.float32)           # (TR, 2TR)
    p1 = (r2[None, :] == 2 * ri[:, None] + 1).astype(jnp.float32)       # (TR, 2TR)
    k1 = jnp.kron(w1m, p0)                                              # (Coh*TR, Cin*2TR)
    k2 = jnp.kron(w2m, p1)                                              # (Coh*TR, Cin*2TR)
    b3 = bias.reshape(Cout, 1, 1)

    # ---- pallas_call: read NCHW x directly, write NCHW out directly ---------
    in_specs = [
        pl.BlockSpec((None, Cin, 2 * TR, W), lambda n, t: (n, 0, t, 0)),
        pl.BlockSpec((W, Wo), lambda n, t: (0, 0)),
        pl.BlockSpec((W, Wo), lambda n, t: (0, 0)),
        pl.BlockSpec((Coh * TR, Cin * 2 * TR), lambda n, t: (0, 0)),
        pl.BlockSpec((Coh * TR, Cin * 2 * TR), lambda n, t: (0, 0)),
        pl.BlockSpec((Cout, 1, 1), lambda n, t: (0, 0, 0)),
    ]
    out_spec = pl.BlockSpec((None, Cout, TR, Wo), lambda n, t: (n, 0, t, 0))

    cp_kwargs = dict(dimension_semantics=("parallel", "parallel"))
    est = _vmem_bytes_estimate(TR, Cin, Cout, W, Wo)
    if est > 12 * 1024 * 1024:
        # raise the scoped-VMEM cap (v5e default 16 MiB) but stay below v7x's
        # 64 MiB physical VMEM
        cp_kwargs["vmem_limit_bytes"] = int(min(max(2 * est, 32 * 1024 * 1024),
                                                48 * 1024 * 1024))

    out = pl.pallas_call(
        _fr_kernel,
        grid=(N, n_t),
        in_specs=in_specs,
        out_specs=out_spec,
        out_shape=jax.ShapeDtypeStruct((N, Cout, Ho, Wo), x.dtype),
        compiler_params=pltpu.CompilerParams(**cp_kwargs),
    )(x, s0, s1, k1, k2, b3)

    return out                                                           # NCHW already


# --------------------------------------------------------------------------- #
# Plain-JAX reference (mirrors the PyTorch module, eval-mode BN)
# --------------------------------------------------------------------------- #
def _reference(x, w1, w2, gamma, beta, rm, rv, eps=1e-5):
    xr = jnp.maximum(x, 0.0)
    o1 = jnp.einsum('nchw,oc->nohw', xr[:, :, 0::2, 0::2], w1[:, :, 0, 0])
    o2 = jnp.einsum('nchw,oc->nohw', xr[:, :, 1::2, 1::2], w2[:, :, 0, 0])
    out = jnp.concatenate([o1, o2], axis=1)
    scale = (gamma / jnp.sqrt(rv + eps)).reshape(1, -1, 1, 1)
    bias = (beta - rm * gamma / jnp.sqrt(rv + eps)).reshape(1, -1, 1, 1)
    return out * scale + bias


if __name__ == "__main__":
    # Module config: in_channels=4, out_channels=8
    N, Cin, H, W = 2, 4, 16, 16
    Cout = 8
    Coh = Cout // 2

    key = jax.random.PRNGKey(0)
    kx, kw1, kw2, kg, kb = jax.random.split(key, 5)

    x = jax.random.normal(kx, (N, Cin, H, W), dtype=jnp.float32)
    # conv weights: (out_channels//2, in_channels, 1, 1), no bias
    w1 = jax.random.normal(kw1, (Coh, Cin, 1, 1), dtype=jnp.float32) * 0.1
    w2 = jax.random.normal(kw2, (Coh, Cin, 1, 1), dtype=jnp.float32) * 0.1
    # BatchNorm2d(out_channels) parameters (eval mode, fresh running stats)
    gamma = 1.0 + 0.1 * jax.random.normal(kg, (Cout,), dtype=jnp.float32)
    beta = 0.1 * jax.random.normal(kb, (Cout,), dtype=jnp.float32)
    running_mean = jnp.zeros((Cout,), dtype=jnp.float32)
    running_var = jnp.ones((Cout,), dtype=jnp.float32)

    out = factorized_reduce(x, w1, w2, gamma, beta, running_mean, running_var)
    out = jax.block_until_ready(out)

    ref = _reference(x, w1, w2, gamma, beta, running_mean, running_var)
    assert out.shape == (N, Cout, H // 2, W // 2), out.shape
    assert jnp.allclose(out, ref, atol=1e-5, rtol=1e-5), "mismatch vs reference"

    print("KERNEL_OK")
</pallas_src>

<mosaic_0001>
module attributes {stable_mosaic.version = 11 : i64} {
  func.func @_fr_kernel(%arg0: i32, %arg1: i32, %arg2: memref<1x4x16x16xf32, #tpu.memory_space<vmem>>, %arg3: memref<16x8xf32, #tpu.memory_space<vmem>>, %arg4: memref<16x8xf32, #tpu.memory_space<vmem>>, %arg5: memref<32x64xf32, #tpu.memory_space<vmem>>, %arg6: memref<32x64xf32, #tpu.memory_space<vmem>>, %arg7: memref<8x1x1xf32, #tpu.memory_space<vmem>>, %arg8: memref<1x8x8x8xf32, #tpu.memory_space<vmem>>) attributes {dimension_semantics = [#tpu.dimension_semantics<parallel>, #tpu.dimension_semantics<parallel>], iteration_bounds = array<i64: 2, 1>, scalar_prefetch = 0 : i64, scratch_operands = 0 : i64, tpu.core_type = #tpu.core_type<tc>, window_params = [{transform_indices = @transform_0, window_bounds = array<i64: 1, 4, 16, 16>}, {pipeline_mode = #tpu.pipeline_mode<synchronous>, transform_indices = @transform_1, window_bounds = array<i64: 16, 8>}, {pipeline_mode = #tpu.pipeline_mode<synchronous>, transform_indices = @transform_2, window_bounds = array<i64: 16, 8>}, {pipeline_mode = #tpu.pipeline_mode<synchronous>, transform_indices = @transform_3, window_bounds = array<i64: 32, 64>}, {pipeline_mode = #tpu.pipeline_mode<synchronous>, transform_indices = @transform_4, window_bounds = array<i64: 32, 64>}, {pipeline_mode = #tpu.pipeline_mode<synchronous>, transform_indices = @transform_5, window_bounds = array<i64: 8, 1, 1>}, {transform_indices = @transform_6, window_bounds = array<i64: 1, 8, 8, 8>}]} {
    %c0 = arith.constant 0 : index
    %c0_0 = arith.constant 0 : index
    %c0_1 = arith.constant 0 : index
    %c0_2 = arith.constant 0 : index
    %0 = vector.load %arg2[%c0, %c0_0, %c0_1, %c0_2] : memref<1x4x16x16xf32, #tpu.memory_space<vmem>>, vector<1x4x16x16xf32>
    %1 = vector.shape_cast %0 : vector<1x4x16x16xf32> to vector<4x16x16xf32>
    %cst = arith.constant 0.000000e+00 : f32
    %2 = vector.broadcast %cst : f32 to vector<4x16x16xf32>
    %3 = arith.maximumf %1, %2 : vector<4x16x16xf32>
    %4 = vector.shape_cast %3 : vector<4x16x16xf32> to vector<64x16xf32>
    %c0_3 = arith.constant 0 : index
    %c0_4 = arith.constant 0 : index
    %5 = vector.load %arg3[%c0_3, %c0_4] : memref<16x8xf32, #tpu.memory_space<vmem>>, vector<16x8xf32>
    %cst_5 = arith.constant dense<0.000000e+00> : vector<64x8xf32>
    %6 = tpu.matmul %4, %5, %cst_5 {dimension_numbers = #tpu.dot_dimension_numbers<[1], [0], [0], [1], [0, 0, 1, 1], [], []>} : vector<64x16xf32>, vector<16x8xf32>, vector<64x8xf32> -> vector<64x8xf32>
    %c0_6 = arith.constant 0 : index
    %c0_7 = arith.constant 0 : index
    %7 = vector.load %arg4[%c0_6, %c0_7] : memref<16x8xf32, #tpu.memory_space<vmem>>, vector<16x8xf32>
    %cst_8 = arith.constant dense<0.000000e+00> : vector<64x8xf32>
    %8 = tpu.matmul %4, %7, %cst_8 {dimension_numbers = #tpu.dot_dimension_numbers<[1], [0], [0], [1], [0, 0, 1, 1], [], []>} : vector<64x16xf32>, vector<16x8xf32>, vector<64x8xf32> -> vector<64x8xf32>
    %c0_9 = arith.constant 0 : index
    %c0_10 = arith.constant 0 : index
    %9 = vector.load %arg5[%c0_9, %c0_10] : memref<32x64xf32, #tpu.memory_space<vmem>>, vector<32x64xf32>
    %cst_11 = arith.constant dense<0.000000e+00> : vector<32x8xf32>
    %10 = tpu.matmul %9, %6, %cst_11 {dimension_numbers = #tpu.dot_dimension_numbers<[1], [0], [0], [1], [0, 0, 1, 1], [], []>} : vector<32x64xf32>, vector<64x8xf32>, vector<32x8xf32> -> vector<32x8xf32>
    %c0_12 = arith.constant 0 : index
    %c0_13 = arith.constant 0 : index
    %11 = vector.load %arg6[%c0_12, %c0_13] : memref<32x64xf32, #tpu.memory_space<vmem>>, vector<32x64xf32>
    %cst_14 = arith.constant dense<0.000000e+00> : vector<32x8xf32>
    %12 = tpu.matmul %11, %8, %cst_14 {dimension_numbers = #tpu.dot_dimension_numbers<[1], [0], [0], [1], [0, 0, 1, 1], [], []>} : vector<32x64xf32>, vector<64x8xf32>, vector<32x8xf32> -> vector<32x8xf32>
    %c0_15 = arith.constant 0 : index
    %c0_16 = arith.constant 0 : index
    %c0_17 = arith.constant 0 : index
    %13 = vector.load %arg7[%c0_15, %c0_16, %c0_17] : memref<8x1x1xf32, #tpu.memory_space<vmem>>, vector<8x1x1xf32>
    %14 = vector.shape_cast %10 : vector<32x8xf32> to vector<4x8x8xf32>
    %15 = vector.extract_strided_slice %13 {offsets = [0, 0, 0], sizes = [4, 1, 1], strides = [1, 1, 1]} : vector<8x1x1xf32> to vector<4x1x1xf32>
    %16 = vector.broadcast %15 : vector<4x1x1xf32> to vector<4x8x8xf32>
    %17 = arith.addf %14, %16 : vector<4x8x8xf32>
    %c0_18 = arith.constant 0 : index
    %c0_19 = arith.constant 0 : index
    %c0_20 = arith.constant 0 : index
    %c0_21 = arith.constant 0 : index
    %18 = vector.load %arg8[%c0_18, %c0_19, %c0_20, %c0_21] : memref<1x8x8x8xf32, #tpu.memory_space<vmem>>, vector<1x4x8x8xf32>
    %19 = vector.shape_cast %18 : vector<1x4x8x8xf32> to vector<4x8x8xf32>
    %20 = vector.shape_cast %17 : vector<4x8x8xf32> to vector<1x4x8x8xf32>
    tpu.vector_store %arg8[%c0_18, %c0_19, %c0_20, %c0_21], %20 {strides = array<i32>} : memref<1x8x8x8xf32, #tpu.memory_space<vmem>>, vector<1x4x8x8xf32>,
    %21 = vector.shape_cast %12 : vector<32x8xf32> to vector<4x8x8xf32>
    %22 = vector.extract_strided_slice %13 {offsets = [4, 0, 0], sizes = [4, 1, 1], strides = [1, 1, 1]} : vector<8x1x1xf32> to vector<4x1x1xf32>
    %23 = vector.broadcast %22 : vector<4x1x1xf32> to vector<4x8x8xf32>
    %24 = arith.addf %21, %23 : vector<4x8x8xf32>
    %c0_22 = arith.constant 0 : index
    %c4 = arith.constant 4 : index
    %c0_23 = arith.constant 0 : index
    %c0_24 = arith.constant 0 : index
    %25 = vector.load %arg8[%c0_22, %c4, %c0_23, %c0_24] : memref<1x8x8x8xf32, #tpu.memory_space<vmem>>, vector<1x4x8x8xf32>
    %26 = vector.shape_cast %25 : vector<1x4x8x8xf32> to vector<4x8x8xf32>
    %27 = vector.shape_cast %24 : vector<4x8x8xf32> to vector<1x4x8x8xf32>
    tpu.vector_store %arg8[%c0_22, %c4, %c0_23, %c0_24], %27 {strides = array<i32>} : memref<1x8x8x8xf32, #tpu.memory_space<vmem>>, vector<1x4x8x8xf32>,
    return
  }
  func.func @transform_0(%arg0: i32, %arg1: i32) -> (i32, i32, i32, i32) {
    %c0_i32 = arith.constant 0 : i32
    %c0_i32_0 = arith.constant 0 : i32
    %c0_i32_1 = arith.constant 0 : i32
    return %arg0, %c0_i32, %arg1, %c0_i32_0 : i32, i32, i32, i32
  }
  func.func @transform_1(%arg0: i32, %arg1: i32) -> (i32, i32) {
    %c0_i32 = arith.constant 0 : i32
    %c0_i32_0 = arith.constant 0 : i32
    %c0_i32_1 = arith.constant 0 : i32
    return %c0_i32, %c0_i32_0 : i32, i32
  }
  func.func @transform_2(%arg0: i32, %arg1: i32) -> (i32, i32) {
    %c0_i32 = arith.constant 0 : i32
    %c0_i32_0 = arith.constant 0 : i32
    %c0_i32_1 = arith.constant 0 : i32
    return %c0_i32, %c0_i32_0 : i32, i32
  }
  func.func @transform_3(%arg0: i32, %arg1: i32) -> (i32, i32) {
    %c0_i32 = arith.constant 0 : i32
    %c0_i32_0 = arith.constant 0 : i32
    %c0_i32_1 = arith.constant 0 : i32
    return %c0_i32, %c0_i32_0 : i32, i32
  }
  func.func @transform_4(%arg0: i32, %arg1: i32) -> (i32, i32) {
    %c0_i32 = arith.constant 0 : i32
    %c0_i32_0 = arith.constant 0 : i32
    %c0_i32_1 = arith.constant 0 : i32
    return %c0_i32, %c0_i32_0 : i32, i32
  }
  func.func @transform_5(%arg0: i32, %arg1: i32) -> (i32, i32, i32) {
    %c0_i32 = arith.constant 0 : i32
    %c0_i32_0 = arith.constant 0 : i32
    %c0_i32_1 = arith.constant 0 : i32
    %c0_i32_2 = arith.constant 0 : i32
    return %c0_i32, %c0_i32_0, %c0_i32_1 : i32, i32, i32
  }
  func.func @transform_6(%arg0: i32, %arg1: i32) -> (i32, i32, i32, i32) {
    %c0_i32 = arith.constant 0 : i32
    %c0_i32_0 = arith.constant 0 : i32
    %c0_i32_1 = arith.constant 0 : i32
    return %arg0, %c0_i32, %arg1, %c0_i32_0 : i32, i32, i32, i32
  }
}

</mosaic_0001>

<bundles_post_ra>
// kernel: tpu_custom_call.1
= control target key start
LH: loop header
LB: loop body
LE: loop exit
PB: predicated region body
PF: predicated region fallthrough
CT: control target
= control target key end

     0   :  { %s1298_s0 = inlined_call_operand.hbm [shape: f32[2,4,16,16], index: 0, kind: input, shape index: {}]   ;;  %s1299_s1 = inlined_call_operand.vmem [shape: f32[16,8], index: 1, kind: input, shape index: {}]   ;;  %s1300_s2 = inlined_call_operand.vmem [shape: f32[16,8], index: 2, kind: input, shape index: {}]   ;;  %s1301_s3 = inlined_call_operand.vmem [shape: f32[32,64], index: 3, kind: input, shape index: {}]   ;;  %s1302_s4 = inlined_call_operand.hbm [shape: f32[32,64], index: 4, kind: input, shape index: {}]   ;;  %s1303_s5 = inlined_call_operand.vmem [shape: f32[8,1,1], index: 5, kind: input, shape index: {}]   ;;  %s1304_s6 = inlined_call_operand.hbm [shape: f32[2,8,8,8], index: 6, kind: output, shape index: {}]  }
   0x1   :  { %1311 = sst [smem:[#allocation14_spill]] %s1302_s4 }
   0x2   :  { %11 = vsyncpa [#allocation3], 0 }
   0x3   :  { %13 = vsyncpa [#allocation3 + $0x1], 0 }
   0x4   :  { %14 = vsyncpa [#allocation6], 0 }
   0x5   :  { %15 = vsyncpa [#allocation4], 0 }
   0x6   :  { %17 = vsyncpa [#allocation4 + $0x1], 0  ;;  %s1038_s21 = smov 0   ;;  %s1040_s22 = smov 0  }
   0x7   :  { %s1042_s23 = smov 0   ;;  %s1044_s24 = smov 0  }
   0x8   :  { %s1046_s25 = smov 0   ;;  %s1048_s26 = smov 0  }
   0x9 LB: > { %1312 = sst [smem:[#allocation11_spill]] %s995_s26  ;;  %s713_s27 = sadd.s32 4294967295, %s995_s26   ;;  %s995_s26 = sphi %s1048_s26, %s23_s26   ;;  %s991_s25 = sphi %s1046_s25, %s1332_s25   ;;  %s987_s24 = sphi %s1044_s24, %s1331_s24   ;;  %s983_s23 = sphi %s1042_s23, %s1330_s23   ;;  %s979_s22 = sphi %s1040_s22, %s1329_s22   ;;  %s975_s21 = sphi %s1038_s21, %s1328_s21  }
   0xa   : > { %s714_s28 = sadd.s32 4294967294, %s995_s26   ;;  %p57_p0 = scmp.ne.s32.totalorder %s979_s22, %s975_s21 }
   0xb   : > { %p1072_p1 = scmp.eq.s32.totalorder %s713_s27, 0  ;;  %p1076_p2 = scmp.eq.s32.totalorder %s713_s27, 1 }
   0xc   : > { %p194_p3 = scmp.eq.s32.totalorder %s714_s28, 1  ;;  %p715_p5 = scmp.ge.s32.totalorder %s995_s26, 1 }
   0xd   : > { %p1082_p4 = por %p1072_p1, %p57_p0  ;;  %p201_p7 = scmp.lt.s32.totalorder %s995_s26, 3 }
   0xe   : > { %p1087_p6 = por %p194_p3, %p57_p0  ;;  %s1318_s4 = sld [smem:[#allocation14_spill]] }
   0xf   : > { %p1095_p8 = pnand %p715_p5, %p201_p7  ;;  %s997_s13 = smov [#allocation5]  }
  0x10   : > { %s1316_s8 = scalar_select %p1087_p6, 1, 0 }
  0x11   : > { %p768_p9 = pneg %p1095_p8  ;;  %s223_s14 = sshll.u32 %s997_s13, 4  ;;  %s224_s14 = int_to_ptr.vmem [resolvable:$true] %s223_s14 }
  0x12   : > { %1317 = sst [smem:[#allocation12_spill]] %s1316_s8  ;;  %p717_p11 = scmp.ge.s32.totalorder %s995_s26, 2 }
  0x13   : > { %p769_p10 = pnand %p768_p9, %p1072_p1  ;;  %s1305_s15 = smov 128  }
  0x14   : > { %s221_s11 = sshll.u32 %s1318_s4, 4  ;;  %s1306_s16 = smov 8   ;;  %s222_s11 = int_to_ptr.hbm [resolvable:$true] %s221_s11 }
  0x15   : > { %771 = dma.hbm_to_vmem [thread:$0]  (!%p769_p10), %s222_s11, 512, %s224_s14, [#allocation6], %s1305_s15, %s1305_s15, %s1306_s16  }
  0x16   : > { %s35_s17 = sadd.s32 1, %s991_s25  ;;  %s44_s18 = sadd.s32 1, %s983_s23 }
  0x17   : > { %p37_p12 = scmp.ge.s32.totalorder %s35_s17, 2  ;;  %p51_p13 = scmp.ne.s32.totalorder %s983_s23, %s979_s22 }
  0x18   : > { %p52_p0 = scmp.eq.s32.totalorder %s995_s26, 0  ;;  %p781_p7 = scmp.lt.s32.totalorder %s995_s26, 2 }
  0x19   : > { %s1334_s17 = smov (%p37_p12, %s35_s17), 0  ;;  %p1120_p5 = por %p1076_p2, %p51_p13 }
  0x1a   : > { %1320 = sst [smem:[#allocation13_spill]] %s1334_s17  ;;  %p1114_p3 = por %p52_p0, %p51_p13 }
  0x1b   : > { %s39_s27 = ssub.s32 %s991_s25, %s1334_s17  ;;  %s240_s28 = sand.u32 1, %s983_s23  }
  0x1c   : > { %p42_p9 = scmp.eq.s32.totalorder %s39_s27, 0  ;;  %s718_s9 = sshll.u32 %s240_s28, 6 }
  0x1d   : > { %s758_s11 = sshll.u32 %s991_s25, 6  ;;  %s244_s16 = scalar_lea.vmem [#allocation2], %s718_s9 }
  0x1e   : > { %s1129_s10 = scalar_select %p42_p9, %s983_s23, %s44_s18  }
  0x1f   : > { %s251_s15 = scalar_lea.hbm %s1298_s0, %s758_s11  ;;  %s254_s4 = sshll.u32 %s244_s16, 4  ;;  %s255_s4 = int_to_ptr.vmem [resolvable:$true] %s254_s4 }
  0x20   : > { %s252_s30 = sshll.u32 %s251_s15, 4  ;;  %p773_p2 = pnand %p781_p7, %p1114_p3  ;;  %s253_s30 = int_to_ptr.hbm [resolvable:$true] %s252_s30 }
  0x21   : > { %s241_s8 = scalar_lea.sflag [#allocation3], %s240_s28  ;;  %s1323_s17 = smov 8  }
  0x22   : > { %s1324_s26 = smov 128   ;;  %266 = sbr.rel (%p1095_p8) target bundleno = 407 (0x197), region = 44 }
  0x23   : > { %775 = dma.hbm_to_vmem [thread:$0]  (!%p773_p2), %s253_s30, 1024, %s255_s4, %s241_s8, %s1324_s26, %s1324_s26, %s1323_s17  }
  0x24   : > { %s1143_s18 = sand.u32 (!%p1095_p8), 1, %s979_s22  }
  0x25   : > { %s722_s15 = sshll.u32 (!%p1095_p8), %s1143_s18, 6  ;;  %s269_s16 = scalar_lea.sflag (!%p1095_p8), [#allocation3], %s1143_s18 }
  0x26   : > { %s1149_s19 = scalar_lea.vmem (!%p1095_p8), [#allocation2], %s722_s15 }
  0x27   : > { %962 = dma.done.wait (%p1082_p4), %s269_s16, 1024  }
  0x28   : > { %964 = vsyncadd (%p1082_p4), %s269_s16, 4294966272 }
  0x29   : > { %966 = dma.done.wait (%p1072_p1), [#allocation6], 512  }
  0x2a   : > { %968 = vsyncadd (%p1072_p1), [#allocation6], 4294966784  ;;  %v325_v0 = vld [vmem:[%s1299_s1 + $0x8] sm:$0xff]  ;;  %v324_v2 = vld [vmem:[%s1299_s1] sm:$0xff]  ;;  %vm326_vm0 = vcmask 130048   ;;  %v1000_v32 = vmov 0  }
  0x2b   : > { %v393_v1 = vld [vmem:[%s1300_s2 + $0x8] sm:$0xff]  ;;  %365 = vmatpush.msra.mxu0 %v325_v0  ;;  %v392_v3 = vld [vmem:[%s1300_s2] sm:$0xff]  ;;  %v310_v8 = vld [vmem:[%s1149_s19 + $0x10] sm:$0xff]  ;;  %839 = vset.pattern.permute.xlu1 %v1000_v32  ;;  %vm439_vm1 = vcmask 523264   ;;  %vm562_vm2 = vcmask 64512   ;;  %s1241_s4 = scalar_lea.vmem [#allocation7], %s722_s15 }
  0x2c   : > { %408 = vmatpush.msra.mxu1 %v393_v1  ;;  %v308_v4 = vld [vmem:[%s1149_s19] sm:$0xff]  ;;  %v309_v6 = vld [vmem:[%s1149_s19 + $0x8] sm:$0xff]  ;;  %v318_v9 = vmax.f32 %v310_v8, 0.0  ;;  %v311_v10 = vld [vmem:[%s1149_s19 + $0x18] sm:$0xff]  ;;  %838 = vset.pattern.permute.xlu0 %v1000_v32  ;;  %s759_s15 = sshll.u32 %s987_s24, 6  ;;  %s614_s17 = sshll.u32 %s1241_s4, 4  ;;  %s615_s17 = int_to_ptr.vmem [resolvable:$true] %s614_s17 }
  0x2d   : > { %v316_v5 = vmax.f32 %v308_v4, 0.0  ;;  %366 = vmatpush.msra.mxu0 %v324_v2  ;;  %v317_v7 = vmax.f32 %v309_v6, 0.0  ;;  %v319_v11 = vmax.f32 %v311_v10, 0.0  ;;  %v312_v12 = vld [vmem:[%s1149_s19 + $0x20] sm:$0xff]  ;;  %v313_v14 = vld [vmem:[%s1149_s19 + $0x28] sm:$0xff]  ;;  %v314_v16 = vld [vmem:[%s1149_s19 + $0x30] sm:$0xff]  ;;  %840 = vset.pattern.permute.xlu2 %v1000_v32  ;;  %s613_s12 = scalar_lea.hbm %s1304_s6, %s759_s15 }
  0x2e   : > { %409 = vmatpush.msra.mxu1 %v392_v3  ;;  %v320_v13 = vmax.f32 %v312_v12, 0.0  ;;  %v321_v15 = vmax.f32 %v313_v14, 0.0  ;;  %v322_v17 = vmax.f32 %v314_v16, 0.0  ;;  %v315_v18 = vld [vmem:[%s1149_s19 + $0x38] sm:$0xff]  ;;  %v841_v33 = vld [vmem:[%s1303_s5 + $0x2] ss:$0 sm:$0xff] }
  0x2f   : > { %725 = vmatmul.msk.f32.vlgmr.msra.gmra.mxu0 %vm326_vm0, %v316_v5  ;;  %733 = vmatmul.msk.f32.vlgmr.msra.gmra.mxu1 %vm326_vm0, %v316_v5  ;;  %v323_v19 = vmax.f32 %v315_v18, 0.0  ;;  %v842_v34 = vld [vmem:[%s1303_s5] ss:$0 sm:$0xff]  ;;  %v843_v37 = vld [vmem:[%s1303_s5 + $0x3] ss:$0 sm:$0xff]  ;;  %v436_v47 = vld [vmem:[%s1301_s3 + $0x8] sm:$0xff] }
  0x30   : > { %551 = vperm.xlu1 %839, %v841_v33   ;;  %543 = vperm.xlu0 %838, %v842_v34   ;;  %v844_v38 = vld [vmem:[%s1303_s5 + $0x1] ss:$0 sm:$0xff]  ;;  %v845_v41 = vld [vmem:[%s1303_s5 + $0x7] ss:$0 sm:$0xff]  ;;  %v846_v42 = vld [vmem:[%s1303_s5 + $0x6] ss:$0 sm:$0xff] }
  0x31   : > { %v847_v43 = vld [vmem:[%s1303_s5 + $0x4] ss:$0 sm:$0xff]  ;;  %v848_v46 = vld [vmem:[%s1303_s5 + $0x5] ss:$0 sm:$0xff]  ;;  %v482_v48 = vld [vmem:[#allocation5 + $0x8] sm:$0xff]  ;;  %s616_s27 = sshll.u32 %s613_s12, 4  ;;  %s617_s27 = int_to_ptr.hbm [resolvable:$true] %s616_s27 }
  0x32   : > { %576 = vperm.xlu2 %840, %v847_v43   ;;  %v435_v44 = vld [vmem:[%s1301_s3] sm:$0xff]  ;;  %v437_v49 = vld [vmem:[%s1301_s3 + $0x10] sm:$0xff]  ;;  %v438_v51 = vld [vmem:[%s1301_s3 + $0x18] sm:$0xff]  ;;  %s601_s24 = scalar_lea.sflag [#allocation4], %s1143_s18  ;;  %s923_s7 = sshra.s32 %s617_s27, 4  ;;  %s924_s7 = int_to_ptr.hbm [resolvable:$true] %s923_s7 }
  0x33   : > { %v481_v45 = vld [vmem:[#allocation5] sm:$0xff]  ;;  %v483_v50 = vld [vmem:[#allocation5 + $0x10] sm:$0xff]  ;;  %v484_v52 = vld [vmem:[#allocation5 + $0x18] sm:$0xff]  ;;  %s925_s29 = scalar_lea.hbm %s924_s7, 64  ;;  %s929_s11 = scalar_lea.hbm %s1304_s6, 128 }
  0x34   : > { %p926_p1 = scmp.ne.s32.totalorder %s924_s7, %s925_s29  ;;  %p930_p10 = scmp.lt.s32.totalorder %s924_s7, %s1304_s6 }
  0x35   : > { %p931_p12 = scmp.lt.s32.totalorder %s929_s11, %s925_s29 }
  0x36   : > { %p927_p4 = pnand %p926_p1, %p1120_p5 }
  0x37   : > { %726 = vmatmul.msk.f32.gmra.mxu0 %vm326_vm0, %v317_v7  ;;  %734 = vmatmul.msk.f32.gmra.mxu1 %vm326_vm0, %v317_v7  ;;  %p932_p13 = por %p931_p12, %p930_p10 }
  0x38   : > { %555 = vperm.xlu1 %839, %v843_v37   ;;  %547 = vperm.xlu0 %838, %v844_v38   ;;  %p928_p8 = pneg %p927_p4 }
  0x3a   : > { %580 = vperm.xlu2 %840, %v848_v46   ;;  %p933_p0 = pnand %p932_p13, %p928_p8 }
  0x3f   : > { %727 = vmatmul.msk.f32.gmra.mxu0 %vm326_vm0, %v318_v9  ;;  %735 = vmatmul.msk.f32.gmra.mxu1 %vm326_vm0, %v318_v9 }
  0x40   : > { %588 = vperm.xlu1 %839, %v845_v41   ;;  %584 = vperm.xlu0 %838, %v846_v42  }
  0x47   : > { %728 = vmatmul.msk.f32.gmra.mxu0 %vm326_vm0, %v319_v11  ;;  %736 = vmatmul.msk.f32.gmra.mxu1 %vm326_vm0, %v319_v11 }
  0x4f   : > { %729 = vmatmul.msk.f32.gmra.mxu0 %vm326_vm0, %v320_v13  ;;  %737 = vmatmul.msk.f32.gmra.mxu1 %vm326_vm0, %v320_v13 }
  0x57   : > { %730 = vmatmul.msk.f32.gmra.mxu0 %vm326_vm0, %v321_v15  ;;  %738 = vmatmul.msk.f32.gmra.mxu1 %vm326_vm0, %v321_v15 }
  0x5f   : > { %731 = vmatmul.msk.f32.gmra.mxu0 %vm326_vm0, %v322_v17  ;;  %739 = vmatmul.msk.f32.gmra.mxu1 %vm326_vm0, %v322_v17 }
  0x67   : > { %732 = vmatmul.msk.f32.gmra.mxu0 %vm326_vm0, %v323_v19  ;;  %740 = vmatmul.msk.f32.gmra.mxu1 %vm326_vm0, %v323_v19 }
  0x8c   : > { %v577_v54 = vpop.permute.xlu2 %576 }
  0x94   : > { %v581_v61 = vpop.permute.xlu2 %580 }
  0xa2   : > { %v544_v53 = vpop.permute.xlu0 %543  ;;  %v552_v59 = vpop.permute.xlu1 %551 }
  0xaa   : > { %v548_v60 = vpop.permute.xlu0 %547  ;;  %v556_v2 = vpop.permute.xlu1 %555 }
  0xac   : > { %v368_v20 = vpop.f32.mrf.mxu0  ;;  %v411_v21 = vpop.f32.mrf.mxu1 }
  0xb2   : > { %v585_v3 = vpop.permute.xlu0 %584  ;;  %v589_v8 = vpop.permute.xlu1 %588 }
  0xb4   : > { %v371_v22 = vpop.f32.mrf.mxu0  ;;  %v414_v23 = vpop.f32.mrf.mxu1 }
  0xbc   : > { %v374_v24 = vpop.f32.mrf.mxu0  ;;  %v417_v25 = vpop.f32.mrf.mxu1 }
  0xc4   : > { %v377_v26 = vpop.f32.mrf.mxu0  ;;  %v420_v27 = vpop.f32.mrf.mxu1 }
  0xcc   : > { %v380_v28 = vpop.f32.mrf.mxu0  ;;  %v423_v29 = vpop.f32.mrf.mxu1 }
  0xd4   : > { %v383_v30 = vpop.f32.mrf.mxu0  ;;  %v426_v31 = vpop.f32.mrf.mxu1 }
  0xdc   : > { %v386_v35 = vpop.f32.mrf.mxu0  ;;  %v429_v36 = vpop.f32.mrf.mxu1 }
  0xe4   : > { %v389_v39 = vpop.f32.mrf.mxu0  ;;  %v432_v40 = vpop.f32.mrf.mxu1 }
  0xe5   : > { %460 = vmatpush.msra.mxu2 %v389_v39  ;;  %505 = vmatpush.msra.mxu3 %v432_v40 }
  0xe7   : > { %461 = vmatpush.msra.mxu2 %v386_v35  ;;  %506 = vmatpush.msra.mxu3 %v429_v36 }
  0xe9   : > { %462 = vmatpush.msra.mxu2 %v383_v30  ;;  %507 = vmatpush.msra.mxu3 %v426_v31 }
  0xeb   : > { %463 = vmatpush.msra.mxu2 %v380_v28  ;;  %508 = vmatpush.msra.mxu3 %v423_v29 }
  0xed   : > { %464 = vmatpush.msra.mxu2 %v377_v26  ;;  %509 = vmatpush.msra.mxu3 %v420_v27 }
  0xef   : > { %465 = vmatpush.msra.mxu2 %v374_v24  ;;  %510 = vmatpush.msra.mxu3 %v417_v25 }
  0xf1   : > { %466 = vmatpush.msra.mxu2 %v371_v22  ;;  %511 = vmatpush.msra.mxu3 %v414_v23 }
  0xf3   : > { %467 = vmatpush.msra.mxu2 %v368_v20  ;;  %512 = vmatpush.msra.mxu3 %v411_v21 }
  0xf4   : > { %741 = vmatmul.msk.f32.vlgmr.msra.gmra.mxu2 %vm439_vm1, %v435_v44  ;;  %745 = vmatmul.msk.f32.vlgmr.msra.gmra.mxu3 %vm439_vm1, %v481_v45 }
  0xfc   : > { %742 = vmatmul.msk.f32.gmra.mxu2 %vm439_vm1, %v436_v47  ;;  %746 = vmatmul.msk.f32.gmra.mxu3 %vm439_vm1, %v482_v48 }
 0x104   : > { %743 = vmatmul.msk.f32.gmra.mxu2 %vm439_vm1, %v437_v49  ;;  %747 = vmatmul.msk.f32.gmra.mxu3 %vm439_vm1, %v483_v50 }
 0x10c   : > { %744 = vmatmul.msk.f32.gmra.mxu2 %vm439_vm1, %v438_v51  ;;  %748 = vmatmul.msk.f32.gmra.mxu3 %vm439_vm1, %v484_v52 }
 0x177   : > { %v469_v55 = vpop.f32.mrf.mxu2  ;;  %v514_v56 = vpop.f32.mrf.mxu3 }
 0x178   : > { %v558_v57 = vadd.f32 %v544_v53, %v469_v55  ;;  %v591_v58 = vadd.f32 %v577_v54, %v514_v56 }
 0x17a   : > { %563 = vst.msk [vmem:[%s1241_s4] sm:$0xff] %vm562_vm2, %v558_v57 }
 0x17b   : > { %749 = vst.msk [vmem:[%s1241_s4 + $0x20] sm:$0xff] %vm562_vm2, %v591_v58 }
 0x17f   : > { %v472_v62 = vpop.f32.mrf.mxu2  ;;  %v517_v63 = vpop.f32.mrf.mxu3 }
 0x180   : > { %v559_v0 = vadd.f32 %v548_v60, %v472_v62  ;;  %v592_v1 = vadd.f32 %v581_v61, %v517_v63 }
 0x182   : > { %564 = vst.msk [vmem:[%s1241_s4 + $0x8] sm:$0xff] %vm562_vm2, %v559_v0 }
 0x183   : > { %750 = vst.msk [vmem:[%s1241_s4 + $0x28] sm:$0xff] %vm562_vm2, %v592_v1 }
 0x187   : > { %v475_v4 = vpop.f32.mrf.mxu2  ;;  %v520_v5 = vpop.f32.mrf.mxu3 }
 0x188   : > { %v560_v6 = vadd.f32 %v552_v59, %v475_v4  ;;  %v593_v7 = vadd.f32 %v585_v3, %v520_v5 }
 0x18a   : > { %565 = vst.msk [vmem:[%s1241_s4 + $0x10] sm:$0xff] %vm562_vm2, %v560_v6 }
 0x18b   : > { %751 = vst.msk [vmem:[%s1241_s4 + $0x30] sm:$0xff] %vm562_vm2, %v593_v7 }
 0x18f   : > { %v478_v9 = vpop.f32.mrf.mxu2  ;;  %v523_v10 = vpop.f32.mrf.mxu3 }
 0x190   : > { %v561_v11 = vadd.f32 %v556_v2, %v478_v9  ;;  %v594_v12 = vadd.f32 %v589_v8, %v523_v10 }
 0x192   : > { %566 = vst.msk [vmem:[%s1241_s4 + $0x18] sm:$0xff] %vm562_vm2, %v561_v11 }
 0x193   : > { %752 = vst.msk [vmem:[%s1241_s4 + $0x38] sm:$0xff] %vm562_vm2, %v594_v12 }
 0x194   : > { %936 = shalt.err (!%p933_p0)
}
 0x195   : > { %s1001_s18 = smov 128   ;;  %s1002_s30 = smov 8  }
 0x196   : > { %766 = dma.vmem_to_hbm [thread:$0]  (%p1120_p5), %s615_s17, 1024, %s617_s27, %s601_s24, %s1001_s18, %s1001_s18, %s1002_s30  }
 0x197 PF: > { %s1326_s19 = sld [smem:[#allocation11_spill]]  ;;  %s631_s4 = sand.u32 1, %s975_s21  }
 0x198   : > { %p777_p3 = pnand %p717_p11, %p1087_p6  ;;  %s632_s15 = scalar_lea.sflag [#allocation4], %s631_s4 }
 0x19a   : > { %p778_p7 = pneg %p777_p3 }
 0x19c   : > { %970 = dma.done.wait (%p778_p7), %s632_s15, 1024  }
 0x19d   : > { %972 = vsyncadd (%p778_p7), %s632_s15, 4294966272  ;;  %s23_s26 = sadd.s32 1, %s1326_s19   ;;  %s1327_s20 = sld [smem:[#allocation13_spill]] }
 0x19e   : > { %p20_p9 = scmp.ge.s32.totalorder %s23_s26, 4   ;;  %s1328_s21 = smov %s979_s22 }
 0x19f   : > { %s1329_s22 = smov %s983_s23  ;;  %s1330_s23 = smov %s1129_s10 }
 0x1a0   : > { %s1331_s24 = smov %s991_s25  ;;  %22 = sbr.rel (!%p20_p9) target bundleno = 9 (0x9), region = 94 }
 0x1a3   : > { %s1332_s25 = smov %s1327_s20 }
 0x1a5   :  { %638 = vsyncpa [#allocation3], 1 }
 0x1a6   :  { %640 = vsyncpa [#allocation3 + $0x1], 1 }
 0x1a7   :  { %641 = vsyncpa [#allocation6], 1 }
 0x1a8   :  { %642 = vsyncpa [#allocation4], 1 }
 0x1a9   :  { %644 = vsyncpa [#allocation4 + $0x1], 1 }

</bundles_post_ra>
